<compile_context>
chip_gen: v5e
topology: v5e:2x2
jax: 0.10.0
libtpu: 0.0.40
codegen_flags: <defaults>
</compile_context>

<pallas_src>
import jax
import jax.numpy as jnp
from jax import lax
from jax.experimental import pallas as pl
from jax.experimental.pallas import tpu as pltpu


def mlp_kernel(x_ref, w1_ref, b1_ref, w2_ref, b2_ref, w3_ref, b3_ref, o_ref):
    # x tile arrives in natural (bt, in_dim) layout; cast (if any) happens in-kernel.
    x = x_ref[...].astype(w1_ref.dtype)
    # Layer 1: contract over in_dim -> (hidden, bt); batch lands on lanes.
    h = lax.dot_general(w1_ref[...], x, (((1,), (1,)), ((), ())),
                        preferred_element_type=jnp.float32)
    h = jnp.maximum(h + b1_ref[...], 0.0)                 # bias + ReLU in f32 (VPU)
    # Layer 2: (hidden, hidden) @ (hidden, bt) -> (hidden, bt)
    h2 = jnp.dot(w2_ref[...], h.astype(w2_ref.dtype),
                 preferred_element_type=jnp.float32)
    h2 = jnp.maximum(h2 + b2_ref[...], 0.0)
    # Layer 3 (hidden -> 1): VPU broadcast-multiply + sublane reduction; the result
    # is already a lane-dense (1, bt) row that maps straight to the output block.
    y = jnp.sum(h2 * w3_ref[...], axis=0, keepdims=True) + b3_ref[...]
    o_ref[...] = y.astype(o_ref.dtype)


def _num_tensorcores():
    """TensorCores reachable by one pallas_call via megacore grid sharding."""
    try:
        kind = (jax.devices()[0].device_kind or "").lower()
    except Exception:
        return 1
    # v4 / v5p (megacore) and v7x have 2 TensorCores per chip; v5e / v6e have 1.
    return 2 if any(t in kind for t in ("v7", "v5p", "v4")) else 1


def _pick_batch_tile(B, in_dim, hidden, num_cores):
    # Per-batch-column VMEM footprint (bytes): double-buffered x rows, two f32
    # (hidden, bt) activations, one cast temp, double-buffered (1, bt) output.
    per_col = 2 * in_dim * 4 + 2 * hidden * 4 + hidden * 2 + 2 * 4
    budget = 20 * 1024 * 1024          # working-set budget, well under every gen's VMEM
    cap = max(128, min(8192, (budget // per_col) // 128 * 128))
    # One big tile per TensorCore; split only so every core gets a grid step.
    tile = -(-B // max(num_cores, 1))            # ceil(B / cores)
    tile = ((tile + 127) // 128) * 128           # round up to a lane multiple
    return max(128, min(cap, tile))


def age_model_forward(x, params, *, batch_tile=None, matmul_dtype=jnp.float32):
    """3-layer MLP forward in one Pallas kernel, tiled over the batch (on lanes)."""
    w1, b1, w2, b2, w3, b3 = params        # PyTorch layout: W (out, in), b (out,)
    B, in_dim = x.shape
    hidden = w1.shape[0]

    if batch_tile is None:
        batch_tile = _pick_batch_tile(B, in_dim, hidden, _num_tensorcores())

    num_tiles = pl.cdiv(B, batch_tile)
    Bp = num_tiles * batch_tile
    if Bp != B:
        # Ragged-batch robustness path only; aligned batches never touch jnp.pad.
        x = jnp.pad(x, ((0, Bp - B), (0, 0)))

    # Tiny resident operands: biases / w3 as (out, 1) columns, weights f32 by default
    # (kernel is overhead-bound, not MXU-bound, so f32 parity with PyTorch is free).
    w1k = w1.astype(matmul_dtype)                          # (hidden, in_dim)
    w2k = w2.astype(matmul_dtype)                          # (hidden, hidden)
    b1k = b1.reshape(hidden, 1).astype(jnp.float32)
    b2k = b2.reshape(hidden, 1).astype(jnp.float32)
    w3k = w3.reshape(hidden, 1).astype(jnp.float32)        # f32 for the VPU reduce
    b3k = b3.reshape(1, 1).astype(jnp.float32)

    # Weights/biases are ~100 KB total; present the full arrays to every grid step.
    full = lambda shape: pl.BlockSpec(shape, lambda i: (0, 0))

    out = pl.pallas_call(
        mlp_kernel,
        out_shape=jax.ShapeDtypeStruct((1, Bp), jnp.float32),   # lane-dense output row
        grid_spec=pltpu.PrefetchScalarGridSpec(
            num_scalar_prefetch=0,
            grid=(num_tiles,),
            in_specs=[
                pl.BlockSpec((batch_tile, in_dim), lambda i: (i, 0)),  # x tile, natural layout
                full((hidden, in_dim)),   # W1
                full((hidden, 1)),        # b1
                full((hidden, hidden)),   # W2
                full((hidden, 1)),        # b2
                full((hidden, 1)),        # W3 (as a column)
                full((1, 1)),             # b3
            ],
            out_specs=pl.BlockSpec((1, batch_tile), lambda i: (0, i)),
        ),
        compiler_params=pltpu.CompilerParams(
            dimension_semantics=("parallel",),
            vmem_limit_bytes=40 * 1024 * 1024,   # headroom for large tiles on every gen
        ),
    )(x, w1k, b1k, w2k, b2k, w3k, b3k)

    return out.reshape(Bp, 1)[:B]


def init_params(key, input_dim, hidden_dim=128):
    """PyTorch-style init, PyTorch layout: W (out, in), b (out,), U(+-1/sqrt(fan_in))."""
    ks = jax.random.split(key, 6)

    def linear(kw, kb, fan_in, fan_out):
        bound = 1.0 / (fan_in ** 0.5)
        w = jax.random.uniform(kw, (fan_out, fan_in), jnp.float32, -bound, bound)
        b = jax.random.uniform(kb, (fan_out,), jnp.float32, -bound, bound)
        return w, b

    w1, b1 = linear(ks[0], ks[1], input_dim, hidden_dim)
    w2, b2 = linear(ks[2], ks[3], hidden_dim, hidden_dim)
    w3, b3 = linear(ks[4], ks[5], hidden_dim, 1)
    return (w1, b1, w2, b2, w3, b3)


def reference_forward(x, params):
    """Plain-JAX f32 forward matching the PyTorch module."""
    w1, b1, w2, b2, w3, b3 = params
    h = jnp.maximum(jnp.dot(x, w1.T, preferred_element_type=jnp.float32) + b1, 0.0)
    h = jnp.maximum(jnp.dot(h, w2.T, preferred_element_type=jnp.float32) + b2, 0.0)
    return jnp.dot(h, w3.T, preferred_element_type=jnp.float32) + b3


if __name__ == "__main__":
    key = jax.random.PRNGKey(0)
    k_x, k_p, k_x2 = jax.random.split(key, 3)

    input_dim, hidden_dim = 32, 128
    params = init_params(k_p, input_dim, hidden_dim)

    # Main case: tile-aligned batch (one tile on single-TC chips, two on v7x).
    batch = 256
    x = jax.random.normal(k_x, (batch, input_dim), jnp.float32)
    out = jax.block_until_ready(age_model_forward(x, params))
    assert out.shape == (batch, 1)
    ref = reference_forward(x, params)
    assert bool(jnp.allclose(out, ref, atol=1e-2, rtol=1e-2)), \
        float(jnp.max(jnp.abs(out - ref)))

    # Ragged batch exercises the (rare) pad-and-slice path.
    batch2 = 37
    x2 = jax.random.normal(k_x2, (batch2, input_dim), jnp.float32)
    out2 = jax.block_until_ready(age_model_forward(x2, params))
    assert out2.shape == (batch2, 1)
    ref2 = reference_forward(x2, params)
    assert bool(jnp.allclose(out2, ref2, atol=1e-2, rtol=1e-2))

    # TODO(synk): num_layers != 2 (extra hidden Linear+ReLU blocks) would need a
    # generalized kernel; this implements the module's default num_layers=2.
    print("KERNEL_OK")
</pallas_src>

<mosaic_0001>
module attributes {stable_mosaic.version = 11 : i64} {
  func.func @mlp_kernel(%arg0: i32, %arg1: memref<256x32xf32, #tpu.memory_space<vmem>>, %arg2: memref<128x32xf32, #tpu.memory_space<vmem>>, %arg3: memref<128x1xf32, #tpu.memory_space<vmem>>, %arg4: memref<128x128xf32, #tpu.memory_space<vmem>>, %arg5: memref<128x1xf32, #tpu.memory_space<vmem>>, %arg6: memref<128x1xf32, #tpu.memory_space<vmem>>, %arg7: memref<1x1xf32, #tpu.memory_space<vmem>>, %arg8: memref<1x256xf32, #tpu.memory_space<vmem>>) attributes {dimension_semantics = [#tpu.dimension_semantics<parallel>], iteration_bounds = array<i64: 1>, scalar_prefetch = 0 : i64, scratch_operands = 0 : i64, tpu.core_type = #tpu.core_type<tc>, window_params = [{transform_indices = @transform_0, window_bounds = array<i64: 256, 32>}, {pipeline_mode = #tpu.pipeline_mode<synchronous>, transform_indices = @transform_1, window_bounds = array<i64: 128, 32>}, {pipeline_mode = #tpu.pipeline_mode<synchronous>, transform_indices = @transform_2, window_bounds = array<i64: 128, 1>}, {pipeline_mode = #tpu.pipeline_mode<synchronous>, transform_indices = @transform_3, window_bounds = array<i64: 128, 128>}, {pipeline_mode = #tpu.pipeline_mode<synchronous>, transform_indices = @transform_4, window_bounds = array<i64: 128, 1>}, {pipeline_mode = #tpu.pipeline_mode<synchronous>, transform_indices = @transform_5, window_bounds = array<i64: 128, 1>}, {pipeline_mode = #tpu.pipeline_mode<synchronous>, transform_indices = @transform_6, window_bounds = array<i64: 1, 1>}, {transform_indices = @transform_7, window_bounds = array<i64: 1, 256>}]} {
    %c0 = arith.constant 0 : index
    %c0_0 = arith.constant 0 : index
    %0 = vector.load %arg1[%c0, %c0_0] : memref<256x32xf32, #tpu.memory_space<vmem>>, vector<256x32xf32>
    %c0_1 = arith.constant 0 : index
    %c0_2 = arith.constant 0 : index
    %1 = vector.load %arg2[%c0_1, %c0_2] : memref<128x32xf32, #tpu.memory_space<vmem>>, vector<128x32xf32>
    %cst = arith.constant dense<0.000000e+00> : vector<128x256xf32>
    %2 = tpu.matmul %1, %0, %cst {dimension_numbers = #tpu.dot_dimension_numbers<[1], [1], [0], [0], [0, 0, 1, 0], [], []>} : vector<128x32xf32>, vector<256x32xf32>, vector<128x256xf32> -> vector<128x256xf32>
    %c0_3 = arith.constant 0 : index
    %c0_4 = arith.constant 0 : index
    %3 = vector.load %arg3[%c0_3, %c0_4] : memref<128x1xf32, #tpu.memory_space<vmem>>, vector<128x1xf32>
    %4 = vector.broadcast %3 : vector<128x1xf32> to vector<128x256xf32>
    %5 = arith.addf %2, %4 : vector<128x256xf32>
    %cst_5 = arith.constant 0.000000e+00 : f32
    %6 = vector.broadcast %cst_5 : f32 to vector<128x256xf32>
    %7 = arith.maximumf %5, %6 : vector<128x256xf32>
    %c0_6 = arith.constant 0 : index
    %c0_7 = arith.constant 0 : index
    %8 = vector.load %arg4[%c0_6, %c0_7] : memref<128x128xf32, #tpu.memory_space<vmem>>, vector<128x128xf32>
    %cst_8 = arith.constant dense<0.000000e+00> : vector<128x256xf32>
    %9 = tpu.matmul %8, %7, %cst_8 {dimension_numbers = #tpu.dot_dimension_numbers<[1], [0], [0], [1], [0, 0, 1, 1], [], []>} : vector<128x128xf32>, vector<128x256xf32>, vector<128x256xf32> -> vector<128x256xf32>
    %c0_9 = arith.constant 0 : index
    %c0_10 = arith.constant 0 : index
    %10 = vector.load %arg5[%c0_9, %c0_10] : memref<128x1xf32, #tpu.memory_space<vmem>>, vector<128x1xf32>
    %11 = vector.broadcast %10 : vector<128x1xf32> to vector<128x256xf32>
    %12 = arith.addf %9, %11 : vector<128x256xf32>
    %cst_11 = arith.constant 0.000000e+00 : f32
    %13 = vector.broadcast %cst_11 : f32 to vector<128x256xf32>
    %14 = arith.maximumf %12, %13 : vector<128x256xf32>
    %c0_12 = arith.constant 0 : index
    %c0_13 = arith.constant 0 : index
    %15 = vector.load %arg6[%c0_12, %c0_13] : memref<128x1xf32, #tpu.memory_space<vmem>>, vector<128x1xf32>
    %16 = vector.broadcast %15 : vector<128x1xf32> to vector<128x256xf32>
    %17 = arith.mulf %14, %16 : vector<128x256xf32>
    %cst_14 = arith.constant dense<0.000000e+00> : vector<256xf32>
    %18 = vector.multi_reduction <add>, %17, %cst_14 [0] : vector<128x256xf32> to vector<256xf32>
    %19 = vector.shape_cast %18 : vector<256xf32> to vector<1x256xf32>
    %c0_15 = arith.constant 0 : index
    %c0_16 = arith.constant 0 : index
    %20 = vector.load %arg7[%c0_15, %c0_16] : memref<1x1xf32, #tpu.memory_space<vmem>>, vector<1x1xf32>
    %21 = vector.broadcast %20 : vector<1x1xf32> to vector<1x256xf32>
    %22 = arith.addf %19, %21 : vector<1x256xf32>
    %c0_17 = arith.constant 0 : index
    %c0_18 = arith.constant 0 : index
    %23 = vector.load %arg8[%c0_17, %c0_18] : memref<1x256xf32, #tpu.memory_space<vmem>>, vector<1x256xf32>
    tpu.vector_store %arg8[%c0_17, %c0_18], %22 {strides = array<i32>} : memref<1x256xf32, #tpu.memory_space<vmem>>, vector<1x256xf32>,
    return
  }
  func.func @transform_0(%arg0: i32) -> (i32, i32) {
    %c0_i32 = arith.constant 0 : i32
    %c0_i32_0 = arith.constant 0 : i32
    return %arg0, %c0_i32 : i32, i32
  }
  func.func @transform_1(%arg0: i32) -> (i32, i32) {
    %c0_i32 = arith.constant 0 : i32
    %c0_i32_0 = arith.constant 0 : i32
    %c0_i32_1 = arith.constant 0 : i32
    return %c0_i32, %c0_i32_0 : i32, i32
  }
  func.func @transform_2(%arg0: i32) -> (i32, i32) {
    %c0_i32 = arith.constant 0 : i32
    %c0_i32_0 = arith.constant 0 : i32
    %c0_i32_1 = arith.constant 0 : i32
    return %c0_i32, %c0_i32_0 : i32, i32
  }
  func.func @transform_3(%arg0: i32) -> (i32, i32) {
    %c0_i32 = arith.constant 0 : i32
    %c0_i32_0 = arith.constant 0 : i32
    %c0_i32_1 = arith.constant 0 : i32
    return %c0_i32, %c0_i32_0 : i32, i32
  }
  func.func @transform_4(%arg0: i32) -> (i32, i32) {
    %c0_i32 = arith.constant 0 : i32
    %c0_i32_0 = arith.constant 0 : i32
    %c0_i32_1 = arith.constant 0 : i32
    return %c0_i32, %c0_i32_0 : i32, i32
  }
  func.func @transform_5(%arg0: i32) -> (i32, i32) {
    %c0_i32 = arith.constant 0 : i32
    %c0_i32_0 = arith.constant 0 : i32
    %c0_i32_1 = arith.constant 0 : i32
    return %c0_i32, %c0_i32_0 : i32, i32
  }
  func.func @transform_6(%arg0: i32) -> (i32, i32) {
    %c0_i32 = arith.constant 0 : i32
    %c0_i32_0 = arith.constant 0 : i32
    %c0_i32_1 = arith.constant 0 : i32
    return %c0_i32, %c0_i32_0 : i32, i32
  }
  func.func @transform_7(%arg0: i32) -> (i32, i32) {
    %c0_i32 = arith.constant 0 : i32
    %c0_i32_0 = arith.constant 0 : i32
    return %c0_i32, %arg0 : i32, i32
  }
}

</mosaic_0001>

<bundles_post_ra>
// kernel: tpu_custom_call.1
= control target key start
LH: loop header
LB: loop body
LE: loop exit
PB: predicated region body
PF: predicated region fallthrough
CT: control target
= control target key end

     0   :  { %s1599_s0 = inlined_call_operand.vmem [shape: f32[256,32], index: 0, kind: input, shape index: {}]   ;;  %s1600_s1 = inlined_call_operand.vmem [shape: f32[128,32], index: 1, kind: input, shape index: {}]   ;;  %s1601_s2 = inlined_call_operand.vmem [shape: f32[128,1], index: 2, kind: input, shape index: {}]   ;;  %s1602_s3 = inlined_call_operand.vmem [shape: f32[128,128], index: 3, kind: input, shape index: {}]   ;;  %s1603_s4 = inlined_call_operand.vmem [shape: f32[128,1], index: 4, kind: input, shape index: {}]   ;;  %s1604_s5 = inlined_call_operand.vmem [shape: f32[128,1], index: 5, kind: input, shape index: {}]   ;;  %s1605_s6 = inlined_call_operand.<no memory space> [shape: f32[1,1], index: 6, kind: input, shape index: {}]   ;;  %s1606_s7 = inlined_call_operand.hbm [shape: f32[1,256], index: 7, kind: output, shape index: {}]  }
   0x1   :  { %v12_v0 = vstv %s1605_s6 }
   0x2   :  { %13 = vst [vmem:[#allocation2] sm:$0x1] %v12_v0 }
   0x3   :  { %v44_v1 = vld [vmem:[%s1599_s0 + $0x78] sm:$0xff]  ;;  %vm173_vm0 = vcmask 261120   ;;  %v43_v3 = vld [vmem:[%s1599_s0 + $0x70] sm:$0xff]  ;;  %v1055_v5 = vmov 0   ;;  %v42_v6 = vld [vmem:[%s1599_s0 + $0x68] sm:$0xff] }
   0x4   :  { %v60_v2 = vld [vmem:[%s1599_s0 + $0xf8] sm:$0xff]  ;;  %960 = vmatpush.xpose.msk.msra.mxu0 %vm173_vm0, %v44_v1  ;;  %v59_v4 = vld [vmem:[%s1599_s0 + $0xf0] sm:$0xff]  ;;  %1026 = vset.pattern.permute.xlu0 %v1055_v5  ;;  %v58_v7 = vld [vmem:[%s1599_s0 + $0xe8] sm:$0xff] }
   0x5   :  { %992 = vmatpush.xpose.msk.msra.mxu1 %vm173_vm0, %v60_v2  ;;  %1027 = vset.pattern.permute.xlu1 %v1055_v5  ;;  %v92_v8 = vld [vmem:[%s1601_s2 + $0x78] sm:$0xff] }
   0x6   :  { %1028 = vset.pattern.permute.xlu2 %v1055_v5  ;;  %170 = vperm.xlu0 %1026, %v92_v8  }
   0x8   :  { %961 = vmatpush.xpose.msk.msra.mxu0 %vm173_vm0, %v43_v3 }
   0x9   :  { %993 = vmatpush.xpose.msk.msra.mxu1 %vm173_vm0, %v59_v4 }
   0xa   :  { %14 = vsyncpa [#allocation4], 0  ;;  %v41_v9 = vld [vmem:[%s1599_s0 + $0x60] sm:$0xff]  ;;  %v91_v11 = vld [vmem:[%s1601_s2 + $0x70] sm:$0xff]  ;;  %s951_s20 = sshll.u32 %s1606_s7, 4  ;;  %vm936_vm1 = vcmask 1040384   ;;  %s952_s20 = int_to_ptr.hbm [resolvable:$true] %s951_s20 }
   0xb   :  { %v57_v10 = vld [vmem:[%s1599_s0 + $0xe0] sm:$0xff]  ;;  %v40_v12 = vld [vmem:[%s1599_s0 + $0x58] sm:$0xff]  ;;  %v39_v14 = vld [vmem:[%s1599_s0 + $0x50] sm:$0xff] }
   0xc   :  { %962 = vmatpush.xpose.msk.msra.mxu0 %vm173_vm0, %v42_v6  ;;  %v56_v13 = vld [vmem:[%s1599_s0 + $0xd8] sm:$0xff]  ;;  %v55_v15 = vld [vmem:[%s1599_s0 + $0xd0] sm:$0xff]  ;;  %v86_v16 = vld [vmem:[%s1601_s2 + $0x48] sm:$0xff] }
   0xd   :  { %994 = vmatpush.xpose.msk.msra.mxu1 %vm173_vm0, %v58_v7  ;;  %v38_v17 = vld [vmem:[%s1599_s0 + $0x48] sm:$0xff]  ;;  %v37_v20 = vld [vmem:[%s1599_s0 + $0x40] sm:$0xff]  ;;  %v83_v22 = vld [vmem:[%s1601_s2 + $0x30] sm:$0xff] }
   0xe   :  { %165 = vperm.xlu0 %1026, %v91_v11   ;;  %v54_v18 = vld [vmem:[%s1599_s0 + $0xc8] sm:$0xff]  ;;  %v53_v21 = vld [vmem:[%s1599_s0 + $0xc0] sm:$0xff]  ;;  %v36_v23 = vld [vmem:[%s1599_s0 + $0x38] sm:$0xff] }
   0xf   :  { %v90_v19 = vld [vmem:[%s1601_s2 + $0x68] sm:$0xff]  ;;  %v52_v24 = vld [vmem:[%s1599_s0 + $0xb8] sm:$0xff]  ;;  %v89_v25 = vld [vmem:[%s1601_s2 + $0x60] sm:$0xff] }
  0x10   :  { %963 = vmatpush.xpose.msk.msra.mxu0 %vm173_vm0, %v41_v9  ;;  %160 = vperm.xlu1 %1027, %v90_v19   ;;  %v35_v26 = vld [vmem:[%s1599_s0 + $0x30] sm:$0xff]  ;;  %v80_v28 = vld [vmem:[%s1601_s2 + $0x18] sm:$0xff]  ;;  %v34_v29 = vld [vmem:[%s1599_s0 + $0x28] sm:$0xff] }
  0x11   :  { %995 = vmatpush.xpose.msk.msra.mxu1 %vm173_vm0, %v57_v10  ;;  %v51_v27 = vld [vmem:[%s1599_s0 + $0xb0] sm:$0xff]  ;;  %v50_v30 = vld [vmem:[%s1599_s0 + $0xa8] sm:$0xff]  ;;  %v88_v31 = vld [vmem:[%s1601_s2 + $0x58] sm:$0xff] }
  0x12   :  { %v85_v32 = vld [vmem:[%s1601_s2 + $0x40] sm:$0xff]  ;;  %150 = vperm.xlu2 %1028, %v88_v31   ;;  %v32_v36 = vld [vmem:[%s1599_s0 + $0x18] sm:$0xff]  ;;  %v87_v38 = vld [vmem:[%s1601_s2 + $0x50] sm:$0xff] }
  0x13   :  { %v33_v33 = vld [vmem:[%s1599_s0 + $0x20] sm:$0xff]  ;;  %v48_v37 = vld [vmem:[%s1599_s0 + $0x98] sm:$0xff]  ;;  %v82_v39 = vld [vmem:[%s1601_s2 + $0x28] sm:$0xff] }
  0x14   :  { %964 = vmatpush.xpose.msk.msra.mxu0 %vm173_vm0, %v40_v12  ;;  %v49_v34 = vld [vmem:[%s1599_s0 + $0xa0] sm:$0xff]  ;;  %v31_v40 = vld [vmem:[%s1599_s0 + $0x10] sm:$0xff]  ;;  %v30_v42 = vld [vmem:[%s1599_s0 + $0x8] sm:$0xff] }
  0x15   :  { %996 = vmatpush.xpose.msk.msra.mxu1 %vm173_vm0, %v56_v13  ;;  %v77_v35 = vld [vmem:[%s1601_s2] sm:$0xff]  ;;  %v47_v41 = vld [vmem:[%s1599_s0 + $0x90] sm:$0xff]  ;;  %v46_v43 = vld [vmem:[%s1599_s0 + $0x88] sm:$0xff] }
  0x16   :  { %140 = vperm.xlu0 %1026, %v86_v16   ;;  %v84_v44 = vld [vmem:[%s1601_s2 + $0x38] sm:$0xff]  ;;  %v79_v45 = vld [vmem:[%s1601_s2 + $0x10] sm:$0xff]  ;;  %v29_v46 = vld [vmem:[%s1599_s0] sm:$0xff] }
  0x17   :  { %v45_v47 = vld [vmem:[%s1599_s0 + $0x80] sm:$0xff]  ;;  %v62_v50 = vld [vmem:[%s1600_s1 + $0x8] sm:$0xff]  ;;  %v498_v51 = vld [vmem:[%s1603_s4 + $0x10] sm:$0xff] }
  0x18   :  { %965 = vmatpush.xpose.msk.msra.mxu0 %vm173_vm0, %v39_v14  ;;  %155 = vperm.xlu1 %1027, %v89_v25   ;;  %v61_v48 = vld [vmem:[%s1600_s1] sm:$0xff]  ;;  %v78_v52 = vld [vmem:[%s1601_s2 + $0x8] sm:$0xff]  ;;  %v63_v54 = vld [vmem:[%s1600_s1 + $0x10] sm:$0xff] }
  0x19   :  { %997 = vmatpush.xpose.msk.msra.mxu1 %vm173_vm0, %v55_v15  ;;  %v81_v49 = vld [vmem:[%s1601_s2 + $0x20] sm:$0xff]  ;;  %v501_v55 = vld [vmem:[%s1603_s4 + $0x28] sm:$0xff]  ;;  %v499_v56 = vld [vmem:[%s1603_s4 + $0x18] sm:$0xff] }
  0x1a   :  { %145 = vperm.xlu2 %1028, %v87_v38   ;;  %v496_v53 = vld [vmem:[%s1603_s4] sm:$0xff]  ;;  %v64_v57 = vld [vmem:[%s1600_s1 + $0x18] sm:$0xff]  ;;  %v502_v59 = vld [vmem:[%s1603_s4 + $0x30] sm:$0xff] }
  0x1b   :  { %v504_v58 = vld [vmem:[%s1603_s4 + $0x40] sm:$0xff]  ;;  %v507_v61 = vld [vmem:[%s1603_s4 + $0x58] sm:$0xff]  ;;  %v505_v62 = vld [vmem:[%s1603_s4 + $0x48] sm:$0xff] }
  0x1c   :  { %966 = vmatpush.xpose.msk.msra.mxu0 %vm173_vm0, %v38_v17  ;;  %v65_v60 = vld [vmem:[%s1600_s1 + $0x20] sm:$0xff]  ;;  %v497_v63 = vld [vmem:[%s1603_s4 + $0x8] sm:$0xff]  ;;  %v510_v1 = vld [vmem:[%s1603_s4 + $0x70] sm:$0xff] }
  0x1d   :  { %998 = vmatpush.xpose.msk.msra.mxu1 %vm173_vm0, %v54_v18  ;;  %v66_v0 = vld [vmem:[%s1600_s1 + $0x28] sm:$0xff]  ;;  %v508_v2 = vld [vmem:[%s1603_s4 + $0x60] sm:$0xff]  ;;  %v67_v4 = vld [vmem:[%s1600_s1 + $0x30] sm:$0xff] }
  0x1e   :  { %125 = vperm.xlu0 %1026, %v83_v22   ;;  %v500_v3 = vld [vmem:[%s1603_s4 + $0x20] sm:$0xff]  ;;  %v755_v5 = vld [vmem:[%s1604_s5 + $0x8] sm:$0xff]  ;;  %v511_v6 = vld [vmem:[%s1603_s4 + $0x78] sm:$0xff] }
  0x1f   :  { %v503_v7 = vld [vmem:[%s1603_s4 + $0x38] sm:$0xff]  ;;  %v758_v9 = vld [vmem:[%s1604_s5 + $0x20] sm:$0xff]  ;;  %v756_v10 = vld [vmem:[%s1604_s5 + $0x10] sm:$0xff] }
  0x20   :  { %967 = vmatpush.xpose.msk.msra.mxu0 %vm173_vm0, %v37_v20  ;;  %135 = vperm.xlu1 %1027, %v85_v32   ;;  %v68_v8 = vld [vmem:[%s1600_s1 + $0x38] sm:$0xff]  ;;  %v506_v11 = vld [vmem:[%s1603_s4 + $0x50] sm:$0xff]  ;;  %v69_v12 = vld [vmem:[%s1600_s1 + $0x40] sm:$0xff] }
  0x21   :  { %999 = vmatpush.xpose.msk.msra.mxu1 %vm173_vm0, %v53_v21  ;;  %v761_v13 = vld [vmem:[%s1604_s5 + $0x38] sm:$0xff]  ;;  %v759_v14 = vld [vmem:[%s1604_s5 + $0x28] sm:$0xff]  ;;  %v764_v17 = vld [vmem:[%s1604_s5 + $0x50] sm:$0xff] }
  0x22   :  { %130 = vperm.xlu2 %1028, %v84_v44   ;;  %v509_v15 = vld [vmem:[%s1603_s4 + $0x68] sm:$0xff]  ;;  %v762_v18 = vld [vmem:[%s1604_s5 + $0x40] sm:$0xff]  ;;  %v71_v20 = vld [vmem:[%s1600_s1 + $0x50] sm:$0xff] }
  0x23   :  { %v70_v16 = vld [vmem:[%s1600_s1 + $0x48] sm:$0xff]  ;;  %v754_v19 = vld [vmem:[%s1604_s5] sm:$0xff]  ;;  %v765_v22 = vld [vmem:[%s1604_s5 + $0x58] sm:$0xff] }
  0x24   :  { %968 = vmatpush.xpose.msk.msra.mxu0 %vm173_vm0, %v36_v23  ;;  %v767_v21 = vld [vmem:[%s1604_s5 + $0x68] sm:$0xff]  ;;  %v757_v23 = vld [vmem:[%s1604_s5 + $0x18] sm:$0xff]  ;;  %v924_v25 = vld [vmem:[#allocation2] sm:$0x1] }
  0x25   :  { %1000 = vmatpush.xpose.msk.msra.mxu1 %vm173_vm0, %v52_v24  ;;  %v72_v24 = vld [vmem:[%s1600_s1 + $0x58] sm:$0xff]  ;;  %v75_v31 = vld [vmem:[%s1600_s1 + $0x70] sm:$0xff]  ;;  %v766_v32 = vld [vmem:[%s1604_s5 + $0x60] sm:$0xff] }
  0x26   :  { %110 = vperm.xlu0 %1026, %v80_v28   ;;  %v760_v28 = vld [vmem:[%s1604_s5 + $0x30] sm:$0xff] }
  0x28   :  { %969 = vmatpush.xpose.msk.msra.mxu0 %vm173_vm0, %v35_v26  ;;  %120 = vperm.xlu1 %1027, %v82_v39   ;;  %v768_v26 = vld [vmem:[%s1604_s5 + $0x70] sm:$0xff] }
  0x29   :  { %1001 = vmatpush.xpose.msk.msra.mxu1 %vm173_vm0, %v51_v27  ;;  %v73_v27 = vld [vmem:[%s1600_s1 + $0x60] sm:$0xff] }
  0x2a   :  { %115 = vperm.xlu2 %1028, %v81_v49  }
  0x2c   :  { %970 = vmatpush.xpose.msk.msra.mxu0 %vm173_vm0, %v34_v29  ;;  %v74_v29 = vld [vmem:[%s1600_s1 + $0x68] sm:$0xff] }
  0x2d   :  { %1002 = vmatpush.xpose.msk.msra.mxu1 %vm173_vm0, %v50_v30  ;;  %v763_v30 = vld [vmem:[%s1604_s5 + $0x48] sm:$0xff] }
  0x2e   :  { %95 = vperm.xlu0 %1026, %v77_v35  }
  0x30   :  { %971 = vmatpush.xpose.msk.msra.mxu0 %vm173_vm0, %v33_v33  ;;  %105 = vperm.xlu1 %1027, %v79_v45   ;;  %v76_v33 = vld [vmem:[%s1600_s1 + $0x78] sm:$0xff] }
  0x31   :  { %1003 = vmatpush.xpose.msk.msra.mxu1 %vm173_vm0, %v49_v34  ;;  %v769_v34 = vld [vmem:[%s1604_s5 + $0x78] sm:$0xff] }
  0x32   :  { %100 = vperm.xlu2 %1028, %v78_v52  }
  0x34   :  { %972 = vmatpush.xpose.msk.msra.mxu0 %vm173_vm0, %v32_v36 }
  0x35   :  { %1004 = vmatpush.xpose.msk.msra.mxu1 %vm173_vm0, %v48_v37 }
  0x36   :  { %524 = vperm.xlu0 %1026, %v498_v51  }
  0x38   :  { %973 = vmatpush.xpose.msk.msra.mxu0 %vm173_vm0, %v31_v40  ;;  %514 = vperm.xlu1 %1027, %v496_v53  }
  0x39   :  { %1005 = vmatpush.xpose.msk.msra.mxu1 %vm173_vm0, %v47_v41 }
  0x3a   :  { %519 = vperm.xlu2 %1028, %v497_v63  }
  0x3c   :  { %974 = vmatpush.xpose.msk.msra.mxu0 %vm173_vm0, %v30_v42 }
  0x3d   :  { %1006 = vmatpush.xpose.msk.msra.mxu1 %vm173_vm0, %v46_v43 }
  0x3e   :  { %539 = vperm.xlu0 %1026, %v501_v55  }
  0x40   :  { %975 = vmatpush.xpose.msk.msra.mxu0 %vm173_vm0, %v29_v46  ;;  %529 = vperm.xlu1 %1027, %v499_v56  }
  0x41   :  { %1007 = vmatpush.xpose.msk.msra.mxu1 %vm173_vm0, %v45_v47 }
  0x42   :  { %534 = vperm.xlu2 %1028, %v500_v3  }
  0x43   :  { %976 = vmatmul.msk.f32.vlgmr.msra.gmra.mxu0 %vm173_vm0, %v61_v48 }
  0x44   :  { %1008 = vmatmul.msk.f32.vlgmr.msra.gmra.mxu1 %vm173_vm0, %v61_v48 }
  0x46   :  { %554 = vperm.xlu0 %1026, %v504_v58  }
  0x48   :  { %544 = vperm.xlu1 %1027, %v502_v59  }
  0x4a   :  { %549 = vperm.xlu2 %1028, %v503_v7  }
  0x4b   :  { %977 = vmatmul.msk.f32.gmra.mxu0 %vm173_vm0, %v62_v50 }
  0x4c   :  { %1009 = vmatmul.msk.f32.gmra.mxu1 %vm173_vm0, %v62_v50 }
  0x4e   :  { %569 = vperm.xlu0 %1026, %v507_v61  }
  0x50   :  { %559 = vperm.xlu1 %1027, %v505_v62  }
  0x52   :  { %564 = vperm.xlu2 %1028, %v506_v11  }
  0x53   :  { %978 = vmatmul.msk.f32.gmra.mxu0 %vm173_vm0, %v63_v54 }
  0x54   :  { %1010 = vmatmul.msk.f32.gmra.mxu1 %vm173_vm0, %v63_v54 }
  0x56   :  { %584 = vperm.xlu0 %1026, %v510_v1  }
  0x58   :  { %574 = vperm.xlu1 %1027, %v508_v2  }
  0x5a   :  { %579 = vperm.xlu2 %1028, %v509_v15  }
  0x5b   :  { %979 = vmatmul.msk.f32.gmra.mxu0 %vm173_vm0, %v64_v57 }
  0x5c   :  { %1011 = vmatmul.msk.f32.gmra.mxu1 %vm173_vm0, %v64_v57 }
  0x5e   :  { %777 = vperm.xlu0 %1026, %v755_v5  }
  0x60   :  { %589 = vperm.xlu1 %1027, %v511_v6  }
  0x62   :  { %772 = vperm.xlu2 %1028, %v754_v19  }
  0x63   :  { %980 = vmatmul.msk.f32.gmra.mxu0 %vm173_vm0, %v65_v60 }
  0x64   :  { %1012 = vmatmul.msk.f32.gmra.mxu1 %vm173_vm0, %v65_v60 }
  0x66   :  { %792 = vperm.xlu0 %1026, %v758_v9  }
  0x68   :  { %782 = vperm.xlu1 %1027, %v756_v10  }
  0x6a   :  { %787 = vperm.xlu2 %1028, %v757_v23  }
  0x6b   :  { %981 = vmatmul.msk.f32.gmra.mxu0 %vm173_vm0, %v66_v0 }
  0x6c   :  { %1013 = vmatmul.msk.f32.gmra.mxu1 %vm173_vm0, %v66_v0  ;;  %v151_v63 = vpop.permute.xlu2 %150 }
  0x6e   :  { %807 = vperm.xlu0 %1026, %v761_v13  }
  0x70   :  { %797 = vperm.xlu1 %1027, %v759_v14  }
  0x72   :  { %802 = vperm.xlu2 %1028, %v760_v28  }
  0x73   :  { %982 = vmatmul.msk.f32.gmra.mxu0 %vm173_vm0, %v67_v4 }
  0x74   :  { %1014 = vmatmul.msk.f32.gmra.mxu1 %vm173_vm0, %v67_v4  ;;  %v146_v6 = vpop.permute.xlu2 %145 }
  0x76   :  { %822 = vperm.xlu0 %1026, %v764_v17  }
  0x78   :  { %812 = vperm.xlu1 %1027, %v762_v18   ;;  %v171_v59 = vpop.permute.xlu0 %170 }
  0x7a   :  { %817 = vperm.xlu2 %1028, %v763_v30  }
  0x7b   :  { %983 = vmatmul.msk.f32.gmra.mxu0 %vm173_vm0, %v68_v8 }
  0x7c   :  { %1015 = vmatmul.msk.f32.gmra.mxu1 %vm173_vm0, %v68_v8  ;;  %v131_v19 = vpop.permute.xlu2 %130 }
  0x7e   :  { %837 = vperm.xlu0 %1026, %v767_v21  }
  0x80   :  { %827 = vperm.xlu1 %1027, %v765_v22   ;;  %v166_v2 = vpop.permute.xlu0 %165 }
  0x82   :  { %832 = vperm.xlu2 %1028, %v766_v32   ;;  %v161_v62 = vpop.permute.xlu1 %160 }
  0x83   :  { %984 = vmatmul.msk.f32.gmra.mxu0 %vm173_vm0, %v69_v12 }
  0x84   :  { %1016 = vmatmul.msk.f32.gmra.mxu1 %vm173_vm0, %v69_v12 }
  0x86   :  { %927 = vperm.xlu0 %1026, %v924_v25  }
  0x88   :  { %842 = vperm.xlu1 %1027, %v768_v26   ;;  %v141_v7 = vpop.permute.xlu0 %140 }
  0x8a   :  { %847 = vperm.xlu2 %1028, %v769_v34   ;;  %v156_v3 = vpop.permute.xlu1 %155 }
  0x8b   :  { %985 = vmatmul.msk.f32.gmra.mxu0 %vm173_vm0, %v70_v16 }
  0x8c   :  { %1017 = vmatmul.msk.f32.gmra.mxu1 %vm173_vm0, %v70_v16 }
  0x92   :  { %v136_v14 = vpop.permute.xlu1 %135 }
  0x93   :  { %986 = vmatmul.msk.f32.gmra.mxu0 %vm173_vm0, %v71_v20 }
  0x94   :  { %1018 = vmatmul.msk.f32.gmra.mxu1 %vm173_vm0, %v71_v20 }
  0x9b   :  { %987 = vmatmul.msk.f32.gmra.mxu0 %vm173_vm0, %v72_v24 }
  0x9c   :  { %1019 = vmatmul.msk.f32.gmra.mxu1 %vm173_vm0, %v72_v24  ;;  %v126_v24 = vpop.permute.xlu0 %125 }
  0xa3   :  { %988 = vmatmul.msk.f32.gmra.mxu0 %vm173_vm0, %v73_v27 }
  0xa4   :  { %1020 = vmatmul.msk.f32.gmra.mxu1 %vm173_vm0, %v73_v27 }
  0xab   :  { %989 = vmatmul.msk.f32.gmra.mxu0 %vm173_vm0, %v74_v29 }
  0xac   :  { %1021 = vmatmul.msk.f32.gmra.mxu1 %vm173_vm0, %v74_v29 }
  0xb3   :  { %990 = vmatmul.msk.f32.gmra.mxu0 %vm173_vm0, %v75_v31 }
  0xb4   :  { %1022 = vmatmul.msk.f32.gmra.mxu1 %vm173_vm0, %v75_v31 }
  0xbb   :  { %991 = vmatmul.msk.f32.gmra.mxu0 %vm173_vm0, %v76_v33 }
  0xbc   :  { %1023 = vmatmul.msk.f32.gmra.mxu1 %vm173_vm0, %v76_v33 }
  0xc0   :  { %v1452_v35 = vpop.f32.mrf.mxu0 }
  0xc1   :  { %v1454_v36 = vpop.f32.mrf.mxu1 }
  0xc8   :  { %v1456_v37 = vpop.f32.mrf.mxu0 }
  0xc9   :  { %v1458_v38 = vpop.f32.mrf.mxu1 }
  0xd0   :  { %v1460_v39 = vpop.f32.mrf.mxu0 }
  0xd1   :  { %v1462_v40 = vpop.f32.mrf.mxu1 }
  0xd8   :  { %v1464_v41 = vpop.f32.mrf.mxu0 }
  0xd9   :  { %v1466_v42 = vpop.f32.mrf.mxu1 }
  0xe0   :  { %v1468_v43 = vpop.f32.mrf.mxu0 }
  0xe1   :  { %v1470_v44 = vpop.f32.mrf.mxu1 }
  0xe8   :  { %v1472_v45 = vpop.f32.mrf.mxu0 }
  0xe9   :  { %v1474_v46 = vpop.f32.mrf.mxu1 }
  0xf0   :  { %v1476_v47 = vpop.f32.mrf.mxu0 }
  0xf1   :  { %v1478_v48 = vpop.f32.mrf.mxu1 }
  0xf8   :  { %v1480_v49 = vpop.f32.mrf.mxu0 }
  0xf9   :  { %v1482_v50 = vpop.f32.mrf.mxu1 }
 0x100   :  { %v359_v51 = vpop.f32.mrf.mxu0 }
 0x101   :  { %v424_v52 = vpop.f32.mrf.mxu1 }
 0x108   :  { %v362_v53 = vpop.f32.mrf.mxu0 }
 0x109   :  { %v427_v54 = vpop.f32.mrf.mxu1  ;;  %v363_v33 = vadd.f32 %v362_v53, %v141_v7  ;;  %v111_v53 = vpop.permute.xlu0 %110 }
 0x10a   :  { %v428_v34 = vadd.f32 %v427_v54, %v141_v7  ;;  %v354_v54 = vadd.f32 %v1476_v47, %v126_v24 }
 0x110   :  { %v365_v55 = vpop.f32.mrf.mxu0 }
 0x111   :  { %v430_v56 = vpop.f32.mrf.mxu1  ;;  %v366_v29 = vadd.f32 %v365_v55, %v146_v6  ;;  %v357_v55 = vadd.f32 %v1480_v49, %v131_v19 }
 0x112   :  { %v431_v30 = vadd.f32 %v430_v56, %v146_v6  ;;  %v422_v56 = vadd.f32 %v1482_v50, %v131_v19 }
 0x113   :  { %v462_v49 = vmax.f32 %v357_v55, 0.0  ;;  %v495_v55 = vld [vmem:[%s1602_s3 + $0x78] sm:$0xff] }
 0x114   :  { %v463_v6 = vmax.f32 %v422_v56, 0.0 }
 0x118   :  { %v368_v57 = vpop.f32.mrf.mxu0 }
 0x119   :  { %v433_v58 = vpop.f32.mrf.mxu1  ;;  %v369_v25 = vadd.f32 %v368_v57, %v151_v63  ;;  %v425_v57 = vadd.f32 %v424_v52, %v136_v14 }
 0x11a   :  { %v434_v26 = vadd.f32 %v433_v58, %v151_v63  ;;  %v468_v58 = vmax.f32 %v366_v29, 0.0  ;;  %v469_v63 = vmax.f32 %v431_v30, 0.0  ;;  %v490_v29 = vld [vmem:[%s1602_s3 + $0x50] sm:$0xff]  ;;  %v491_v30 = vld [vmem:[%s1602_s3 + $0x58] sm:$0xff] }
 0x11b   :  { %v465_v52 = vmax.f32 %v425_v57, 0.0  ;;  %v494_v57 = vld [vmem:[%s1602_s3 + $0x70] sm:$0xff] }
 0x120   :  { %v371_v60 = vpop.f32.mrf.mxu0 }
 0x121   :  { %v436_v61 = vpop.f32.mrf.mxu1  ;;  %v372_v20 = vadd.f32 %v371_v60, %v156_v3  ;;  %v471_v60 = vmax.f32 %v434_v26, 0.0  ;;  %v487_v26 = vld [vmem:[%s1602_s3 + $0x38] sm:$0xff] }
 0x122   :  { %v437_v21 = vadd.f32 %v436_v61, %v156_v3  ;;  %v121_v61 = vpop.permute.xlu1 %120  ;;  %v419_v3 = vadd.f32 %v1478_v48, %v126_v24  ;;  %v485_v24 = vld [vmem:[%s1602_s3 + $0x28] sm:$0xff] }
 0x123   :  { %v472_v31 = vmax.f32 %v372_v20, 0.0 }
 0x124   :  { %v473_v32 = vmax.f32 %v437_v21, 0.0  ;;  %v461_v47 = vmax.f32 %v419_v3, 0.0 }
 0x128   :  { %v374_v0 = vpop.f32.mrf.mxu0 }
 0x129   :  { %v439_v1 = vpop.f32.mrf.mxu1  ;;  %v375_v15 = vadd.f32 %v374_v0, %v161_v62  ;;  %v116_v0 = vpop.permute.xlu2 %115 }
 0x12a   :  { %v440_v16 = vadd.f32 %v439_v1, %v161_v62  ;;  %v360_v62 = vadd.f32 %v359_v51, %v136_v14  ;;  %v466_v1 = vmax.f32 %v363_v33, 0.0  ;;  %v348_v50 = vadd.f32 %v1468_v43, %v116_v0  ;;  %v106_v48 = vpop.permute.xlu1 %105  ;;  %v96_v14 = vpop.permute.xlu0 %95 }
 0x12b   :  { %v474_v27 = vmax.f32 %v375_v15, 0.0  ;;  %v413_v7 = vadd.f32 %v1470_v44, %v116_v0  ;;  %v407_v43 = vadd.f32 %v1462_v40, %v106_v48 }
 0x12c   :  { %v475_v28 = vmax.f32 %v440_v16, 0.0  ;;  %v464_v51 = vmax.f32 %v360_v62, 0.0 }
 0x12d   :  { %v457_v44 = vmax.f32 %v413_v7, 0.0  ;;  %v453_v19 = vmax.f32 %v407_v43, 0.0 }
 0x130   :  { %v377_v4 = vpop.f32.mrf.mxu0 }
 0x131   :  { %v442_v5 = vpop.f32.mrf.mxu1  ;;  %v378_v10 = vadd.f32 %v377_v4, %v166_v2  ;;  %v351_v4 = vadd.f32 %v1472_v45, %v121_v61 }
 0x132   :  { %v443_v11 = vadd.f32 %v442_v5, %v166_v2  ;;  %v467_v2 = vmax.f32 %v428_v34, 0.0  ;;  %v416_v5 = vadd.f32 %v1474_v46, %v121_v61  ;;  %v101_v46 = vpop.permute.xlu2 %100  ;;  %v492_v34 = vld [vmem:[%s1602_s3 + $0x60] sm:$0xff] }
 0x133   :  { %v476_v22 = vmax.f32 %v378_v10, 0.0  ;;  %v410_v10 = vadd.f32 %v1466_v42, %v111_v53  ;;  %v458_v45 = vmax.f32 %v351_v4, 0.0  ;;  %v339_v15 = vadd.f32 %v1456_v37, %v101_v46 }
 0x134   :  { %v477_v23 = vmax.f32 %v443_v11, 0.0  ;;  %v459_v11 = vmax.f32 %v416_v5, 0.0 }
 0x135   :  { %v455_v42 = vmax.f32 %v410_v10, 0.0  ;;  %v450_v40 = vmax.f32 %v339_v15, 0.0 }
 0x138   :  { %v380_v8 = vpop.f32.mrf.mxu0 }
 0x139   :  { %v445_v9 = vpop.f32.mrf.mxu1  ;;  %v381_v12 = vadd.f32 %v380_v8, %v171_v59  ;;  %v460_v8 = vmax.f32 %v354_v54, 0.0 }
 0x13a   :  { %v446_v13 = vadd.f32 %v445_v9, %v171_v59  ;;  %v470_v59 = vmax.f32 %v369_v25, 0.0  ;;  %v345_v9 = vadd.f32 %v1464_v41, %v111_v53  ;;  %v404_v41 = vadd.f32 %v1458_v38, %v101_v46  ;;  %v480_v38 = vld [vmem:[%s1602_s3] sm:$0xff]  ;;  %v486_v25 = vld [vmem:[%s1602_s3 + $0x30] sm:$0xff]  ;;  %v520_v33 = vpop.permute.xlu2 %519 }
 0x13b   :  { %v478_v17 = vmax.f32 %v381_v12, 0.0  ;;  %v342_v12 = vadd.f32 %v1460_v39, %v106_v48 }
 0x13c   :  { %v479_v18 = vmax.f32 %v446_v13, 0.0  ;;  %v456_v13 = vmax.f32 %v348_v50, 0.0  ;;  %v454_v16 = vmax.f32 %v345_v9, 0.0  ;;  %v451_v20 = vmax.f32 %v404_v41, 0.0 }
 0x13d   :  { %592 = vmatpush.msra.mxu2 %v478_v17  ;;  %v336_v17 = vadd.f32 %v1452_v35, %v96_v14  ;;  %v452_v39 = vmax.f32 %v342_v12, 0.0  ;;  %v481_v35 = vld [vmem:[%s1602_s3 + $0x8] sm:$0xff] }
 0x13e   :  { %657 = vmatpush.msra.mxu3 %v479_v18  ;;  %v401_v18 = vadd.f32 %v1454_v36, %v96_v14  ;;  %v482_v36 = vld [vmem:[%s1602_s3 + $0x10] sm:$0xff] }
 0x13f   :  { %593 = vmatpush.msra.mxu2 %v476_v22  ;;  %v448_v21 = vmax.f32 %v336_v17, 0.0  ;;  %v483_v22 = vld [vmem:[%s1602_s3 + $0x18] sm:$0xff] }
 0x140   :  { %658 = vmatpush.msra.mxu3 %v477_v23  ;;  %v449_v37 = vmax.f32 %v401_v18, 0.0  ;;  %v484_v23 = vld [vmem:[%s1602_s3 + $0x20] sm:$0xff] }
 0x141   :  { %594 = vmatpush.msra.mxu2 %v474_v27  ;;  %v488_v27 = vld [vmem:[%s1602_s3 + $0x40] sm:$0xff] }
 0x142   :  { %659 = vmatpush.msra.mxu3 %v475_v28  ;;  %v489_v28 = vld [vmem:[%s1602_s3 + $0x48] sm:$0xff]  ;;  %v1544_v62 = vpop.permute.xlu2 %534 }
 0x143   :  { %595 = vmatpush.msra.mxu2 %v472_v31  ;;  %v515_v31 = vpop.permute.xlu1 %514 }
 0x144   :  { %660 = vmatpush.msra.mxu3 %v473_v32  ;;  %v525_v32 = vpop.permute.xlu0 %524 }
 0x145   :  { %596 = vmatpush.msra.mxu2 %v470_v59 }
 0x146   :  { %661 = vmatpush.msra.mxu3 %v471_v60  ;;  %v493_v60 = vld [vmem:[%s1602_s3 + $0x68] sm:$0xff]  ;;  %s1056_s3 = smov [#allocation3]  }
 0x147   :  { %597 = vmatpush.msra.mxu2 %v468_v58  ;;  %s949_s17 = sshll.u32 %s1056_s3, 4  ;;  %s950_s17 = int_to_ptr.vmem [resolvable:$true] %s949_s17 }
 0x148   :  { %662 = vmatpush.msra.mxu3 %v469_v63 }
 0x149   :  { %598 = vmatpush.msra.mxu2 %v466_v1 }
 0x14a   :  { %663 = vmatpush.msra.mxu3 %v467_v2  ;;  %v1553_v0 = vpop.permute.xlu2 %549 }
 0x14b   :  { %599 = vmatpush.msra.mxu2 %v464_v51  ;;  %v530_v59 = vpop.permute.xlu1 %529 }
 0x14c   :  { %664 = vmatpush.msra.mxu3 %v465_v52  ;;  %v1542_v61 = vpop.permute.xlu0 %539 }
 0x14d   :  { %600 = vmatpush.msra.mxu2 %v462_v49 }
 0x14e   :  { %665 = vmatpush.msra.mxu3 %v463_v6 }
 0x14f   :  { %601 = vmatpush.msra.mxu2 %v460_v8 }
 0x150   :  { %666 = vmatpush.msra.mxu3 %v461_v47 }
 0x151   :  { %602 = vmatpush.msra.mxu2 %v458_v45 }
 0x152   :  { %667 = vmatpush.msra.mxu3 %v459_v11  ;;  %v1562_v2 = vpop.permute.xlu2 %564 }
 0x153   :  { %603 = vmatpush.msra.mxu2 %v456_v13  ;;  %v1549_v58 = vpop.permute.xlu1 %544 }
 0x154   :  { %668 = vmatpush.msra.mxu3 %v457_v44  ;;  %v1551_v63 = vpop.permute.xlu0 %554 }
 0x155   :  { %604 = vmatpush.msra.mxu2 %v454_v16 }
 0x156   :  { %669 = vmatpush.msra.mxu3 %v455_v42 }
 0x157   :  { %605 = vmatpush.msra.mxu2 %v452_v39 }
 0x158   :  { %670 = vmatpush.msra.mxu3 %v453_v19 }
 0x159   :  { %606 = vmatpush.msra.mxu2 %v450_v40 }
 0x15a   :  { %671 = vmatpush.msra.mxu3 %v451_v20  ;;  %v1568_v52 = vpop.permute.xlu2 %579 }
 0x15b   :  { %607 = vmatpush.msra.mxu2 %v448_v21  ;;  %v1558_v56 = vpop.permute.xlu1 %559 }
 0x15c   :  { %672 = vmatpush.msra.mxu3 %v449_v37  ;;  %608 = vmatmul.f32.vlgmr.msra.gmra.mxu2 %v480_v38  ;;  %v1560_v1 = vpop.permute.xlu0 %569 }
 0x15d   :  { %673 = vmatmul.f32.vlgmr.msra.gmra.mxu3 %v480_v38 }
 0x162   :  { %v773_v11 = vpop.permute.xlu2 %772 }
 0x163   :  { %v1564_v53 = vpop.permute.xlu1 %574 }
 0x164   :  { %611 = vmatmul.f32.gmra.mxu2 %v481_v35  ;;  %v1566_v51 = vpop.permute.xlu0 %584 }
 0x165   :  { %676 = vmatmul.f32.gmra.mxu3 %v481_v35 }
 0x16b   :  { %v1570_v48 = vpop.permute.xlu1 %589 }
 0x16c   :  { %614 = vmatmul.f32.gmra.mxu2 %v482_v36  ;;  %v778_v45 = vpop.permute.xlu0 %777 }
 0x16d   :  { %679 = vmatmul.f32.gmra.mxu3 %v482_v36 }
 0x173   :  { %v783_v39 = vpop.permute.xlu1 %782 }
 0x174   :  { %617 = vmatmul.f32.gmra.mxu2 %v483_v22 }
 0x175   :  { %682 = vmatmul.f32.gmra.mxu3 %v483_v22 }
 0x17c   :  { %620 = vmatmul.f32.gmra.mxu2 %v484_v23 }
 0x17d   :  { %685 = vmatmul.f32.gmra.mxu3 %v484_v23 }
 0x184   :  { %623 = vmatmul.f32.gmra.mxu2 %v485_v24 }
 0x185   :  { %688 = vmatmul.f32.gmra.mxu3 %v485_v24  ;;  %v788_v24 = vpop.permute.xlu2 %787 }
 0x18c   :  { %626 = vmatmul.f32.gmra.mxu2 %v486_v25 }
 0x18d   :  { %691 = vmatmul.f32.gmra.mxu3 %v486_v25 }
 0x194   :  { %629 = vmatmul.f32.gmra.mxu2 %v487_v26 }
 0x195   :  { %694 = vmatmul.f32.gmra.mxu3 %v487_v26 }
 0x19c   :  { %632 = vmatmul.f32.gmra.mxu2 %v488_v27 }
 0x19d   :  { %697 = vmatmul.f32.gmra.mxu3 %v488_v27 }
 0x1a4   :  { %635 = vmatmul.f32.gmra.mxu2 %v489_v28 }
 0x1a5   :  { %700 = vmatmul.f32.gmra.mxu3 %v489_v28 }
 0x1ac   :  { %638 = vmatmul.f32.gmra.mxu2 %v490_v29 }
 0x1ad   :  { %703 = vmatmul.f32.gmra.mxu3 %v490_v29 }
 0x1b4   :  { %641 = vmatmul.f32.gmra.mxu2 %v491_v30 }
 0x1b5   :  { %706 = vmatmul.f32.gmra.mxu3 %v491_v30 }
 0x1bc   :  { %644 = vmatmul.f32.gmra.mxu2 %v492_v34 }
 0x1bd   :  { %709 = vmatmul.f32.gmra.mxu3 %v492_v34 }
 0x1c4   :  { %647 = vmatmul.f32.gmra.mxu2 %v493_v60 }
 0x1c5   :  { %712 = vmatmul.f32.gmra.mxu3 %v493_v60  ;;  %v793_v60 = vpop.permute.xlu0 %792 }
 0x1cc   :  { %650 = vmatmul.f32.gmra.mxu2 %v494_v57 }
 0x1cd   :  { %715 = vmatmul.f32.gmra.mxu3 %v494_v57 }
 0x1d4   :  { %653 = vmatmul.f32.gmra.mxu2 %v495_v55 }
 0x1d5   :  { %718 = vmatmul.f32.gmra.mxu3 %v495_v55 }
 0x1df   :  { %v609_v54 = vpop.f32.mrf.mxu2 }
 0x1e0   :  { %v674_v3 = vpop.f32.mrf.mxu3  ;;  %v610_v4 = vadd.f32 %v609_v54, %v515_v31 }
 0x1e1   :  { %v675_v5 = vadd.f32 %v674_v3, %v515_v31 }
 0x1e2   :  { %v722_v50 = vmax.f32 %v610_v4, 0.0 }
 0x1e3   :  { %v723_v7 = vmax.f32 %v675_v5, 0.0 }
 0x1e4   :  { %v850_v46 = vmul.f32 %v773_v11, %v722_v50 }
 0x1e5   :  { %v851_v12 = vmul.f32 %v773_v11, %v723_v7 }
 0x1e7   :  { %v612_v49 = vpop.f32.mrf.mxu2 }
 0x1e8   :  { %v677_v6 = vpop.f32.mrf.mxu3  ;;  %v613_v8 = vadd.f32 %v612_v49, %v520_v33 }
 0x1e9   :  { %v678_v47 = vadd.f32 %v677_v6, %v520_v33 }
 0x1ea   :  { %v724_v9 = vmax.f32 %v613_v8, 0.0 }
 0x1eb   :  { %v725_v10 = vmax.f32 %v678_v47, 0.0 }
 0x1ec   :  { %v852_v43 = vmul.f32 %v778_v45, %v724_v9 }
 0x1ed   :  { %v853_v13 = vmul.f32 %v778_v45, %v725_v10 }
 0x1ee   :  { %v882_v44 = vadd.f32 %v852_v43, %v850_v46  ;;  %v798_v46 = vpop.permute.xlu1 %797 }
 0x1ef   :  { %v903_v14 = vadd.f32 %v853_v13, %v851_v12  ;;  %v615_v15 = vpop.f32.mrf.mxu2  ;;  %v803_v12 = vpop.permute.xlu2 %802 }
 0x1f0   :  { %v680_v41 = vpop.f32.mrf.mxu3  ;;  %v616_v16 = vadd.f32 %v615_v15, %v525_v32 }
 0x1f1   :  { %v681_v42 = vadd.f32 %v680_v41, %v525_v32 }
 0x1f2   :  { %v726_v17 = vmax.f32 %v616_v16, 0.0 }
 0x1f3   :  { %v727_v18 = vmax.f32 %v681_v42, 0.0 }
 0x1f4   :  { %v854_v19 = vmul.f32 %v783_v39, %v726_v17 }
 0x1f5   :  { %v855_v40 = vmul.f32 %v783_v39, %v727_v18  ;;  %v808_v39 = vpop.permute.xlu0 %807 }
 0x1f6   :  { %v883_v20 = vadd.f32 %v882_v44, %v854_v19  ;;  %v813_v19 = vpop.permute.xlu1 %812 }
 0x1f7   :  { %v904_v21 = vadd.f32 %v903_v14, %v855_v40  ;;  %v618_v37 = vpop.f32.mrf.mxu2 }
 0x1f8   :  { %v683_v38 = vpop.f32.mrf.mxu3  ;;  %v619_v35 = vadd.f32 %v618_v37, %v530_v59 }
 0x1f9   :  { %v684_v36 = vadd.f32 %v683_v38, %v530_v59 }
 0x1fa   :  { %v728_v22 = vmax.f32 %v619_v35, 0.0 }
 0x1fb   :  { %v729_v23 = vmax.f32 %v684_v36, 0.0 }
 0x1fc   :  { %v856_v25 = vmul.f32 %v788_v24, %v728_v22 }
 0x1fd   :  { %v857_v26 = vmul.f32 %v788_v24, %v729_v23  ;;  %v818_v23 = vpop.permute.xlu2 %817 }
 0x1fe   :  { %v884_v27 = vadd.f32 %v883_v20, %v856_v25 }
 0x1ff   :  { %v905_v28 = vadd.f32 %v904_v21, %v857_v26  ;;  %v621_v29 = vpop.f32.mrf.mxu2 }
 0x200   :  { %v686_v30 = vpop.f32.mrf.mxu3  ;;  %v622_v31 = vadd.f32 %v621_v29, %v1544_v62 }
 0x201   :  { %v687_v32 = vadd.f32 %v686_v30, %v1544_v62 }
 0x202   :  { %v730_v33 = vmax.f32 %v622_v31, 0.0 }
 0x203   :  { %v731_v34 = vmax.f32 %v687_v32, 0.0 }
 0x204   :  { %v858_v57 = vmul.f32 %v793_v60, %v730_v33 }
 0x205   :  { %v859_v55 = vmul.f32 %v793_v60, %v731_v34 }
 0x206   :  { %v885_v54 = vadd.f32 %v884_v27, %v858_v57 }
 0x207   :  { %v906_v59 = vadd.f32 %v905_v28, %v859_v55  ;;  %v624_v3 = vpop.f32.mrf.mxu2 }
 0x208   :  { %v689_v4 = vpop.f32.mrf.mxu3  ;;  %v625_v43 = vadd.f32 %v624_v3, %v1542_v61 }
 0x209   :  { %v690_v13 = vadd.f32 %v689_v4, %v1542_v61 }
 0x20a   :  { %v732_v16 = vmax.f32 %v625_v43, 0.0 }
 0x20b   :  { %v733_v42 = vmax.f32 %v690_v13, 0.0 }
 0x20c   :  { %v860_v37 = vmul.f32 %v798_v46, %v732_v16  ;;  %v833_v16 = vpop.permute.xlu2 %832 }
 0x20d   :  { %v861_v38 = vmul.f32 %v798_v46, %v733_v42 }
 0x20f   :  { %v627_v5 = vpop.f32.mrf.mxu2  ;;  %v907_v31 = vadd.f32 %v906_v59, %v861_v38  ;;  %v828_v59 = vpop.permute.xlu1 %827 }
 0x210   :  { %v692_v49 = vpop.f32.mrf.mxu3  ;;  %v628_v44 = vadd.f32 %v627_v5, %v1549_v58 }
 0x211   :  { %v693_v14 = vadd.f32 %v692_v49, %v1549_v58  ;;  %v823_v49 = vpop.permute.xlu0 %822 }
 0x212   :  { %v734_v40 = vmax.f32 %v628_v44, 0.0 }
 0x213   :  { %v735_v20 = vmax.f32 %v693_v14, 0.0 }
 0x214   :  { %v862_v24 = vmul.f32 %v803_v12, %v734_v40 }
 0x215   :  { %v863_v25 = vmul.f32 %v803_v12, %v735_v20 }
 0x217   :  { %v630_v6 = vpop.f32.mrf.mxu2  ;;  %v908_v3 = vadd.f32 %v907_v31, %v863_v25 }
 0x218   :  { %v695_v50 = vpop.f32.mrf.mxu3  ;;  %v631_v17 = vadd.f32 %v630_v6, %v1553_v0 }
 0x219   :  { %v696_v18 = vadd.f32 %v695_v50, %v1553_v0 }
 0x21a   :  { %v736_v35 = vmax.f32 %v631_v17, 0.0 }
 0x21b   :  { %v737_v58 = vmax.f32 %v696_v18, 0.0 }
 0x21c   :  { %v864_v32 = vmul.f32 %v808_v39, %v736_v35  ;;  %v838_v35 = vpop.permute.xlu0 %837 }
 0x21d   :  { %v865_v33 = vmul.f32 %v808_v39, %v737_v58 }
 0x21f   :  { %v633_v7 = vpop.f32.mrf.mxu2 }
 0x220   :  { %v698_v8 = vpop.f32.mrf.mxu3  ;;  %v634_v21 = vadd.f32 %v633_v7, %v1551_v63 }
 0x221   :  { %v699_v61 = vadd.f32 %v698_v8, %v1551_v63  ;;  %v886_v63 = vadd.f32 %v885_v54, %v860_v37  ;;  %v909_v8 = vadd.f32 %v908_v3, %v865_v33 }
 0x222   :  { %v738_v0 = vmax.f32 %v634_v21, 0.0 }
 0x223   :  { %v739_v26 = vmax.f32 %v699_v61, 0.0  ;;  %v887_v55 = vadd.f32 %v886_v63, %v862_v24 }
 0x224   :  { %v866_v4 = vmul.f32 %v813_v19, %v738_v0 }
 0x225   :  { %v867_v5 = vmul.f32 %v813_v19, %v739_v26  ;;  %v888_v7 = vadd.f32 %v887_v55, %v864_v32 }
 0x227   :  { %v636_v47 = vpop.f32.mrf.mxu2 }
 0x228   :  { %v701_v9 = vpop.f32.mrf.mxu3  ;;  %v637_v36 = vadd.f32 %v636_v47, %v1558_v56 }
 0x229   :  { %v702_v22 = vadd.f32 %v701_v9, %v1558_v56 }
 0x22a   :  { %v740_v34 = vmax.f32 %v637_v36, 0.0 }
 0x22b   :  { %v741_v60 = vmax.f32 %v702_v22, 0.0  ;;  %v843_v22 = vpop.permute.xlu1 %842 }
 0x22c   :  { %v868_v47 = vmul.f32 %v818_v23, %v740_v34  ;;  %v848_v34 = vpop.permute.xlu2 %847 }
 0x22d   :  { %v869_v9 = vmul.f32 %v818_v23, %v741_v60 }
 0x22f   :  { %v639_v10 = vpop.f32.mrf.mxu2 }
 0x230   :  { %v704_v45 = vpop.f32.mrf.mxu3  ;;  %v640_v27 = vadd.f32 %v639_v10, %v1562_v2 }
 0x231   :  { %v705_v28 = vadd.f32 %v704_v45, %v1562_v2 }
 0x232   :  { %v742_v6 = vmax.f32 %v640_v27, 0.0 }
 0x233   :  { %v743_v50 = vmax.f32 %v705_v28, 0.0 }
 0x234   :  { %v870_v12 = vmul.f32 %v823_v49, %v742_v6 }
 0x235   :  { %v871_v43 = vmul.f32 %v823_v49, %v743_v50 }
 0x237   :  { %v642_v62 = vpop.f32.mrf.mxu2 }
 0x238   :  { %v707_v11 = vpop.f32.mrf.mxu3  ;;  %v643_v57 = vadd.f32 %v642_v62, %v1560_v1  ;;  %v889_v62 = vadd.f32 %v888_v7, %v866_v4 }
 0x239   :  { %v708_v56 = vadd.f32 %v707_v11, %v1560_v1  ;;  %v910_v1 = vadd.f32 %v909_v8, %v867_v5 }
 0x23a   :  { %v744_v10 = vmax.f32 %v643_v57, 0.0  ;;  %v890_v42 = vadd.f32 %v889_v62, %v868_v47  ;;  %v939_v62 = vlaneseq }
 0x23b   :  { %v745_v45 = vmax.f32 %v708_v56, 0.0  ;;  %v911_v17 = vadd.f32 %v910_v1, %v869_v9 }
 0x23c   :  { %v872_v18 = vmul.f32 %v828_v59, %v744_v10  ;;  %v891_v20 = vadd.f32 %v890_v42, %v870_v12  ;;  %vm941_vm2 = vcmp.lt.s32.totalorder %v939_v62, 256 }
 0x23d   :  { %v873_v39 = vmul.f32 %v828_v59, %v745_v45  ;;  %v912_v21 = vadd.f32 %v911_v17, %v871_v43 }
 0x23e   :  { %v892_v58 = vadd.f32 %v891_v20, %v872_v18 }
 0x23f   :  { %v645_v15 = vpop.f32.mrf.mxu2  ;;  %v913_v36 = vadd.f32 %v912_v21, %v873_v39 }
 0x240   :  { %v710_v41 = vpop.f32.mrf.mxu3  ;;  %v646_v2 = vadd.f32 %v645_v15, %v1564_v53 }
 0x241   :  { %v711_v54 = vadd.f32 %v710_v41, %v1564_v53 }
 0x242   :  { %v746_v13 = vmax.f32 %v646_v2, 0.0 }
 0x243   :  { %v747_v44 = vmax.f32 %v711_v54, 0.0 }
 0x245   :  { %v875_v61 = vmul.f32 %v833_v16, %v747_v44 }
 0x247   :  { %v648_v29 = vpop.f32.mrf.mxu2  ;;  %v914_v25 = vadd.f32 %v913_v36, %v875_v61 }
 0x248   :  { %v713_v30 = vpop.f32.mrf.mxu3  ;;  %v649_v11 = vadd.f32 %v648_v29, %v1568_v52 }
 0x249   :  { %v714_v46 = vadd.f32 %v713_v30, %v1568_v52  ;;  %v874_v52 = vmul.f32 %v833_v16, %v746_v13 }
 0x24a   :  { %v748_v19 = vmax.f32 %v649_v11, 0.0 }
 0x24b   :  { %v749_v40 = vmax.f32 %v714_v46, 0.0 }
 0x24c   :  { %v876_v23 = vmul.f32 %v838_v35, %v748_v19 }
 0x24d   :  { %v877_v24 = vmul.f32 %v838_v35, %v749_v40 }
 0x24f   :  { %v651_v14 = vpop.f32.mrf.mxu2  ;;  %v915_v31 = vadd.f32 %v914_v25, %v877_v24 }
 0x250   :  { %v716_v15 = vpop.f32.mrf.mxu3  ;;  %v652_v53 = vadd.f32 %v651_v14, %v1566_v51 }
 0x251   :  { %v717_v41 = vadd.f32 %v716_v15, %v1566_v51  ;;  %v893_v51 = vadd.f32 %v892_v58, %v874_v52 }
 0x252   :  { %v750_v37 = vmax.f32 %v652_v53, 0.0 }
 0x253   :  { %v751_v38 = vmax.f32 %v717_v41, 0.0  ;;  %v894_v63 = vadd.f32 %v893_v51, %v876_v23 }
 0x254   :  { %v878_v27 = vmul.f32 %v843_v22, %v750_v37 }
 0x255   :  { %v879_v28 = vmul.f32 %v843_v22, %v751_v38 }
 0x256   :  { %v895_v60 = vadd.f32 %v894_v63, %v878_v27 }
 0x257   :  { %v654_v0 = vpop.f32.mrf.mxu2  ;;  %v916_v57 = vadd.f32 %v915_v31, %v879_v28 }
 0x258   :  { %v719_v26 = vpop.f32.mrf.mxu3  ;;  %v655_v29 = vadd.f32 %v654_v0, %v1570_v48 }
 0x259   :  { %v720_v30 = vadd.f32 %v719_v26, %v1570_v48  ;;  %v928_v48 = vpop.permute.xlu0 %927 }
 0x25a   :  { %v752_v32 = vmax.f32 %v655_v29, 0.0  ;;  %v930_v9 = vperm.slane %v928_v48, 0 }
 0x25b   :  { %v753_v33 = vmax.f32 %v720_v30, 0.0 }
 0x25c   :  { %v880_v56 = vmul.f32 %v848_v34, %v752_v32 }
 0x25d   :  { %v881_v55 = vmul.f32 %v848_v34, %v753_v33 }
 0x25e   :  { %v896_v3 = vadd.f32 %v895_v60, %v880_v56 }
 0x25f   :  { %v917_v4 = vadd.f32 %v916_v57, %v881_v55 }
 0x260   :  { %v897_v5 = vrot.slane %v896_v3, 4 }
 0x261   :  { %v918_v49 = vrot.slane %v917_v4, 4 }
 0x262   :  { %v898_v6 = vadd.f32 %v897_v5, %v896_v3 }
 0x263   :  { %v919_v50 = vadd.f32 %v918_v49, %v917_v4 }
 0x264   :  { %v899_v2 = vrot.slane %v898_v6, 2 }
 0x265   :  { %v920_v54 = vrot.slane %v919_v50, 2 }
 0x266   :  { %v900_v59 = vadd.f32 %v899_v2, %v898_v6 }
 0x267   :  { %v921_v7 = vadd.f32 %v920_v54, %v919_v50 }
 0x268   :  { %v901_v8 = vrot.slane %v900_v59, 1 }
 0x269   :  { %v922_v47 = vrot.slane %v921_v7, 1 }
 0x26a   :  { %v902_v45 = vadd.f32 %v901_v8, %v900_v59 }
 0x26b   :  { %v923_v10 = vadd.f32 %v922_v47, %v921_v7 }
 0x26c   :  { %v931_v11 = vadd.f32 %v930_v9, %v902_v45 }
 0x26d   :  { %v932_v1 = vadd.f32 %v930_v9, %v923_v10 }
 0x26f   :  { %v935_v46 = vrot.slane %v932_v1, 7 }
 0x271   :  { %v937_v12 = vsel %vm936_vm1, %v931_v11, %v935_v46 }
 0x272   :  { %943 = vst.msk [vmem:[#allocation3] sm:$0x3] %vm941_vm2, %v937_v12 }
 0x273   :  { %954 = dma.vmem_to_hbm [thread:$0]  %s950_s17, 32, %s952_s20, [#allocation4]  }
 0x274   :  { %1053 = dma.done.wait [#allocation4], 32  }
 0x275   :  { %1054 = vsyncadd [#allocation4], 4294967264 }
 0x276   :  { %959 = vsyncpa [#allocation4], 1 }

</bundles_post_ra>
